<compile_context>
chip_gen: v6e
topology: v6e:2x2x1
jax: 0.10.0
libtpu: 0.0.40
codegen_flags: <defaults>
</compile_context>

<pallas_src>
import jax
import jax.numpy as jnp
from jax.experimental import pallas as pl
from jax.experimental.pallas import tpu as pltpu

LANE = 128


def _round_up(x: int, m: int) -> int:
    return ((x + m - 1) // m) * m


def _cdiv(a: int, b: int) -> int:
    return (a + b - 1) // b


def classifier_kernel(x_ref, w1_ref, b1_ref, w2_ref, b2_ref, out_ref):
    # embedding: Linear + ReLU. x arrives in its native dtype and is cast to
    # the bf16 weight dtype inside VMEM (the VPU cast hides under the DMA
    # pipeline). MXU matmuls accumulate in f32; bias/ReLU epilogue in f32.
    x_b = x_ref[...].astype(w1_ref.dtype)
    h = jnp.dot(x_b, w1_ref[...], preferred_element_type=jnp.float32)
    h = jnp.maximum(h + b1_ref[...], 0.0)                  # (TB, P) + (1, P)
    # output head: second MXU matmul in bf16, f32 accumulation.
    y = jnp.dot(h.astype(w2_ref.dtype), w2_ref[...],
                preferred_element_type=jnp.float32)
    out_ref[...] = (y + b2_ref[...]).astype(out_ref.dtype)  # (TB, Cp) + (1, Cp)


def prepare_classifier_params(w1, b1, w2, b2, *, param_dtype=jnp.bfloat16,
                              lane=LANE):
    """One-time parameter preparation: bf16 cast + lane-padding of the class
    dimension. Call once at load time and reuse the result across forward
    calls so per-call HBM traffic is only x + logits (no repeated weight
    cast/pad passes)."""
    D_in, P = w1.shape
    C = w2.shape[1]
    C_pad = _round_up(C, lane)

    w1_b = jnp.asarray(w1, param_dtype)                    # (D_in, P)
    b1_p = jnp.asarray(b1, jnp.float32).reshape(1, P)      # (1, P)   f32 bias
    w2_b = jnp.asarray(w2, param_dtype)                    # (P, C)
    b2_p = jnp.asarray(b2, jnp.float32).reshape(1, C)      # (1, C)   f32 bias
    if C_pad != C:
        # Zero class-padding -> lane-dense output store; padded columns are 0.
        w2_b = jnp.pad(w2_b, ((0, 0), (0, C_pad - C)))
        b2_p = jnp.pad(b2_p, ((0, 0), (0, C_pad - C)))
    return (w1_b, b1_p, w2_b, b2_p), C


def _resident_spec(shape):
    # Constant index_map across the grid -> DMA'd once; single-buffered to
    # halve the resident-weight VMEM footprint (matters on v7x 64 MiB/TC and
    # under v5e's 16 MiB default scoped VMEM).
    return pl.BlockSpec(shape, lambda i: (0, 0),
                        pipeline_mode=pl.Buffered(buffer_count=1))


def classifier_forward(x, params, num_classes, *, tile_b=512, out_dtype=None):
    """Fused classifier forward on prepared (bf16, class-padded) params."""
    w1_b, b1_p, w2_b, b2_p = params
    B, D_in = x.shape
    P = w1_b.shape[1]
    C_pad = w2_b.shape[1]
    out_dtype = x.dtype if out_dtype is None else out_dtype

    # Batch tile: multiple of 16 (packed bf16 sublanes), no bigger than the
    # batch needs, and guaranteeing >= 2 grid steps on the "parallel" axis
    # when B allows (keeps both v7x TensorCores busy).
    tile_b = max(16, (int(tile_b) // 16) * 16)
    tile_b = min(tile_b, _round_up(B, 16))
    if B > 16:
        tile_b = min(tile_b, _round_up(_cdiv(B, 2), 16))
    grid = (_cdiv(B, tile_b),)   # ragged last tile: Pallas masks the store

    x_item = jnp.dtype(x.dtype).itemsize
    w_item = jnp.dtype(w1_b.dtype).itemsize
    out_item = jnp.dtype(out_dtype).itemsize

    cost = pl.CostEstimate(
        flops=2 * B * (D_in * P + P * C_pad),
        transcendentals=0,
        bytes_accessed=(x.size * x_item
                        + (w1_b.size + w2_b.size) * w_item
                        + (b1_p.size + b2_p.size) * 4
                        + B * C_pad * out_item),
    )

    # Explicit VMEM budget from the real footprint (double-buffered x/out
    # tiles, single-buffered resident weights, in-kernel temporaries).
    footprint = (
        2 * tile_b * D_in * x_item            # x tiles (pipelined, 2 bufs)
        + 2 * tile_b * C_pad * out_item       # out tiles (pipelined, 2 bufs)
        + (w1_b.size + w2_b.size) * w_item    # resident weights (1 buf each)
        + (b1_p.size + b2_p.size) * 4         # resident biases
        + tile_b * D_in * 2                   # bf16 x copy
        + tile_b * P * (4 + 2)                # f32 h + bf16 h
        + tile_b * C_pad * 4                  # f32 y
    )
    vmem_limit = min(max(int(1.5 * footprint) + (2 << 20), 8 << 20), 64 << 20)

    out_p = pl.pallas_call(
        classifier_kernel,
        out_shape=jax.ShapeDtypeStruct((B, C_pad), out_dtype),
        grid_spec=pltpu.PrefetchScalarGridSpec(
            num_scalar_prefetch=0,
            grid=grid,
            in_specs=[
                pl.BlockSpec((tile_b, D_in), lambda i: (i, 0)),  # x tile
                _resident_spec((D_in, P)),                       # W1 (resident)
                _resident_spec((1, P)),                          # b1
                _resident_spec((P, C_pad)),                      # W2 (resident)
                _resident_spec((1, C_pad)),                      # b2
            ],
            out_specs=pl.BlockSpec((tile_b, C_pad), lambda i: (i, 0)),
        ),
        compiler_params=pltpu.CompilerParams(
            dimension_semantics=("parallel",),
            vmem_limit_bytes=vmem_limit),
        cost_estimate=cost,
    )(x, w1_b, b1_p, w2_b, b2_p)

    # Strip class padding outside the kernel (batch is not padded anymore).
    return out_p[:, :num_classes]


def reference_forward(x, w1, b1, w2, b2):
    h = jnp.maximum(x @ w1 + b1.reshape(1, -1), 0.0)
    return h @ w2 + b2.reshape(1, -1)


if __name__ == "__main__":
    # Small shapes consistent with the module's forward:
    #   batch=200 (not tile-aligned -> exercises the ragged last tile),
    #   input features=32, pre_output_categories=128,
    #   num_classes=10 (lane-padded to 128 inside the prepared params).
    B, D_in, P, C = 200, 32, 128, 10

    key = jax.random.PRNGKey(0)
    kx, kw1, kb1, kw2, kb2 = jax.random.split(key, 5)

    x = jax.random.normal(kx, (B, D_in), dtype=jnp.float32)
    # Deterministic synthetic parameters (no checkpoint loading).
    w1 = jax.random.normal(kw1, (D_in, P), dtype=jnp.float32) * (1.0 / jnp.sqrt(D_in))
    b1 = jax.random.normal(kb1, (P,), dtype=jnp.float32) * 0.01
    w2 = jax.random.normal(kw2, (P, C), dtype=jnp.float32) * (1.0 / jnp.sqrt(P))
    b2 = jax.random.normal(kb2, (C,), dtype=jnp.float32) * 0.01

    # Weight prep happens once; reuse `params` across forward calls.
    params, num_classes = prepare_classifier_params(w1, b1, w2, b2)
    params = jax.block_until_ready(params)

    # tile_b=512 requested -> clamped to 112 so grid=(2,) parallel steps.
    out = classifier_forward(x, params, num_classes, tile_b=512)
    out = jax.block_until_ready(out)

    ref = reference_forward(x, w1, b1, w2, b2)
    assert out.shape == (B, C)
    # Tolerance accounts for bf16 MXU operands (f32 accumulation).
    assert jnp.allclose(out, ref, atol=5e-2, rtol=5e-2), "mismatch vs reference"

    print("KERNEL_OK")
</pallas_src>

<mosaic_0001>
module attributes {stable_mosaic.version = 11 : i64} {
  func.func @classifier_kernel(%arg0: i32, %arg1: memref<112x32xf32, #tpu.memory_space<vmem>>, %arg2: memref<32x128xbf16, #tpu.memory_space<vmem>>, %arg3: memref<1x128xf32, #tpu.memory_space<vmem>>, %arg4: memref<128x128xbf16, #tpu.memory_space<vmem>>, %arg5: memref<1x128xf32, #tpu.memory_space<vmem>>, %arg6: memref<112x128xf32, #tpu.memory_space<vmem>>) attributes {dimension_semantics = [#tpu.dimension_semantics<parallel>], iteration_bounds = array<i64: 2>, scalar_prefetch = 0 : i64, scratch_operands = 0 : i64, tpu.core_type = #tpu.core_type<tc>, window_params = [{transform_indices = @transform_0, window_bounds = array<i64: 112, 32>}, {pipeline_mode = #tpu.pipeline_mode<synchronous>, transform_indices = @transform_1, window_bounds = array<i64: 32, 128>}, {pipeline_mode = #tpu.pipeline_mode<synchronous>, transform_indices = @transform_2, window_bounds = array<i64: 1, 128>}, {pipeline_mode = #tpu.pipeline_mode<synchronous>, transform_indices = @transform_3, window_bounds = array<i64: 128, 128>}, {pipeline_mode = #tpu.pipeline_mode<synchronous>, transform_indices = @transform_4, window_bounds = array<i64: 1, 128>}, {transform_indices = @transform_5, window_bounds = array<i64: 112, 128>}]} {
    %c0 = arith.constant 0 : index
    %c0_0 = arith.constant 0 : index
    %0 = vector.load %arg1[%c0, %c0_0] : memref<112x32xf32, #tpu.memory_space<vmem>>, vector<112x32xf32>
    %1 = arith.truncf %0 : vector<112x32xf32> to vector<112x32xbf16>
    %c0_1 = arith.constant 0 : index
    %c0_2 = arith.constant 0 : index
    %2 = vector.load %arg2[%c0_1, %c0_2] : memref<32x128xbf16, #tpu.memory_space<vmem>>, vector<32x128xbf16>
    %cst = arith.constant dense<0.000000e+00> : vector<112x128xf32>
    %3 = tpu.matmul %1, %2, %cst {dimension_numbers = #tpu.dot_dimension_numbers<[1], [0], [0], [1], [0, 0, 1, 1], [], []>} : vector<112x32xbf16>, vector<32x128xbf16>, vector<112x128xf32> -> vector<112x128xf32>
    %c0_3 = arith.constant 0 : index
    %c0_4 = arith.constant 0 : index
    %4 = vector.load %arg3[%c0_3, %c0_4] : memref<1x128xf32, #tpu.memory_space<vmem>>, vector<1x128xf32>
    %5 = vector.broadcast %4 : vector<1x128xf32> to vector<112x128xf32>
    %6 = arith.addf %3, %5 : vector<112x128xf32>
    %cst_5 = arith.constant 0.000000e+00 : f32
    %7 = vector.broadcast %cst_5 : f32 to vector<112x128xf32>
    %8 = arith.maximumf %6, %7 : vector<112x128xf32>
    %9 = arith.truncf %8 : vector<112x128xf32> to vector<112x128xbf16>
    %c0_6 = arith.constant 0 : index
    %c0_7 = arith.constant 0 : index
    %10 = vector.load %arg4[%c0_6, %c0_7] : memref<128x128xbf16, #tpu.memory_space<vmem>>, vector<128x128xbf16>
    %cst_8 = arith.constant dense<0.000000e+00> : vector<112x128xf32>
    %11 = tpu.matmul %9, %10, %cst_8 {dimension_numbers = #tpu.dot_dimension_numbers<[1], [0], [0], [1], [0, 0, 1, 1], [], []>} : vector<112x128xbf16>, vector<128x128xbf16>, vector<112x128xf32> -> vector<112x128xf32>
    %c0_9 = arith.constant 0 : index
    %c0_10 = arith.constant 0 : index
    %12 = vector.load %arg5[%c0_9, %c0_10] : memref<1x128xf32, #tpu.memory_space<vmem>>, vector<1x128xf32>
    %13 = vector.broadcast %12 : vector<1x128xf32> to vector<112x128xf32>
    %14 = arith.addf %11, %13 : vector<112x128xf32>
    %c0_11 = arith.constant 0 : index
    %c0_12 = arith.constant 0 : index
    %15 = vector.load %arg6[%c0_11, %c0_12] : memref<112x128xf32, #tpu.memory_space<vmem>>, vector<112x128xf32>
    tpu.vector_store %arg6[%c0_11, %c0_12], %14 {strides = array<i32>} : memref<112x128xf32, #tpu.memory_space<vmem>>, vector<112x128xf32>,
    return
  }
  func.func @transform_0(%arg0: i32) -> (i32, i32) {
    %c0_i32 = arith.constant 0 : i32
    %c0_i32_0 = arith.constant 0 : i32
    return %arg0, %c0_i32 : i32, i32
  }
  func.func @transform_1(%arg0: i32) -> (i32, i32) {
    %c0_i32 = arith.constant 0 : i32
    %c0_i32_0 = arith.constant 0 : i32
    %c0_i32_1 = arith.constant 0 : i32
    return %c0_i32, %c0_i32_0 : i32, i32
  }
  func.func @transform_2(%arg0: i32) -> (i32, i32) {
    %c0_i32 = arith.constant 0 : i32
    %c0_i32_0 = arith.constant 0 : i32
    %c0_i32_1 = arith.constant 0 : i32
    return %c0_i32, %c0_i32_0 : i32, i32
  }
  func.func @transform_3(%arg0: i32) -> (i32, i32) {
    %c0_i32 = arith.constant 0 : i32
    %c0_i32_0 = arith.constant 0 : i32
    %c0_i32_1 = arith.constant 0 : i32
    return %c0_i32, %c0_i32_0 : i32, i32
  }
  func.func @transform_4(%arg0: i32) -> (i32, i32) {
    %c0_i32 = arith.constant 0 : i32
    %c0_i32_0 = arith.constant 0 : i32
    %c0_i32_1 = arith.constant 0 : i32
    return %c0_i32, %c0_i32_0 : i32, i32
  }
  func.func @transform_5(%arg0: i32) -> (i32, i32) {
    %c0_i32 = arith.constant 0 : i32
    %c0_i32_0 = arith.constant 0 : i32
    return %arg0, %c0_i32 : i32, i32
  }
}

</mosaic_0001>

<bundles_post_ra>
// kernel: tpu_custom_call.1
= control target key start
LH: loop header
LB: loop body
LE: loop exit
PB: predicated region body
PF: predicated region fallthrough
CT: control target
= control target key end

     0   :  { %10 = vsyncpa [#allocation3], 0  ;;  %s1239_s0 = inlined_call_operand.vmem [shape: f32[200,32], index: 0, kind: input, shape index: {}]   ;;  %s1240_s1 = inlined_call_operand.vmem [shape: bf16[32,128], index: 1, kind: input, shape index: {}]   ;;  %s1241_s2 = inlined_call_operand.vmem [shape: f32[1,128], index: 2, kind: input, shape index: {}]   ;;  %s1242_s3 = inlined_call_operand.vmem [shape: bf16[128,128], index: 3, kind: input, shape index: {}]   ;;  %s1243_s4 = inlined_call_operand.vmem [shape: f32[1,128], index: 4, kind: input, shape index: {}]   ;;  %s1244_s5 = inlined_call_operand.hbm [shape: f32[200,128], index: 5, kind: output, shape index: {}]  }
   0x1   :  { %12 = vsyncpa [#allocation3 + $0x1], 0  ;;  %s981_s18 = smov 0   ;;  %s983_s19 = smov 0  }
   0x2   :  { %s985_s20 = smov 0   ;;  %s987_s21 = smov 0  }
   0x3 LB: > { %s1002_s22 = sadd.s32 4294967295, %s944_s21   ;;  %s683_s23 = sadd.s32 4294967294, %s944_s21   ;;  %s944_s21 = sphi %s987_s21, %s1250_s21   ;;  %s940_s20 = sphi %s985_s20, %s1249_s20   ;;  %s936_s19 = sphi %s983_s19, %s1248_s19   ;;  %s932_s18 = sphi %s981_s18, %s1247_s18  }
   0x4   : > { %s1006_s24 = sadd.s32 1, %s944_s21   ;;  %s135_s25 = sadd.s32 1, %s940_s20 }
   0x5   : > { %s132_s26 = ssub.s32 %s944_s21, %s1006_s24  ;;  %p145_p0 = scmp.ne.s32.totalorder %s940_s20, %s936_s19 }
   0x6   : > { %p133_p1 = scmp.eq.s32.totalorder %s132_s26, 0  ;;  %p146_p2 = scmp.eq.s32.totalorder %s1002_s22, 1 }
   0x7   : > { %p151_p3 = scmp.ne.s32.totalorder %s936_s19, %s932_s18  ;;  %p152_p4 = scmp.eq.s32.totalorder %s683_s23, 1 }
   0x8   : > { %s1017_s27 = scalar_select %p133_p1, %s940_s20, %s135_s25  }
   0x9   : > { %p1019_p5 = por %p146_p2, %p145_p0  ;;  %p1023_p6 = por %p152_p4, %p151_p3 }
   0xa   : > { %p686_p7 = scmp.ge.s32.totalorder %s944_s21, 1  ;;  %p199_p8 = scmp.lt.s32.totalorder %s944_s21, 3 }
   0xc   : > { %p200_p9 = pnand %p686_p7, %p199_p8 }
   0xd   : > { %s1040_s9 = smul.u32 (!%p200_p9), 14, %s1002_s22 }
   0xe   : > { %203 = sbr.rel (%p200_p9) target bundleno = 506 (0x1fa), region = 40 }
   0xf   : > { %p236_p10 = scmp.lt.s32.totalorder (!%p200_p9), %s1040_s9, 24 }
  0x13   : > { %v874_v0 = vld [vmem:[%s1240_s1 + $0x8] sm:$0xff]   ;;  %v946_v1 = vmov 0.0   ;;  %v875_v2 = vld [vmem:[%s1240_s1] sm:$0xff]   ;;  %vm947_vm0 = vmmov 0   ;;  %v876_v3 = vld [vmem:[%s1242_s3 + $0x38] sm:$0xff]   ;;  %s237_s12 = scalar_select %p236_p10, %s1040_s9, 24 }
  0x14   : > { %739 = vmatprep.subr.bf16.mxu0 %v946_v1  ;;  %815 = vmatprep.subr.bf16.mxu1 %v946_v1  ;;  %v877_v4 = vld [vmem:[%s1242_s3 + $0x30] sm:$0xff]   ;;  %vm295_vm1 = vcmask 261120   ;;  %v878_v8 = vld [vmem:[%s1242_s3 + $0x28] sm:$0xff]   ;;  %v879_v11 = vld [vmem:[%s1242_s3 + $0x20] sm:$0xff]   ;;  %s610_s8 = ssub.s32 (%p1019_p5), 25, %s1040_s9 }
  0x15   : > { %740 = vmatpush3.bf16.msra.mxu0 %v874_v0  ;;  %743 = vmatprep.mubr.msk.bf16.mxu0 %vm947_vm0, %v946_v1  ;;  %s687_s15 = sshll.u32 %s237_s12, 3  ;;  %v880_v13 = vld [vmem:[%s1242_s3 + $0x18] sm:$0xff]   ;;  %v881_v29 = vld [vmem:[%s1242_s3 + $0x10] sm:$0xff]   ;;  %v882_v30 = vld [vmem:[%s1242_s3 + $0x8] sm:$0xff]   ;;  %p611_p11 = scmp.lt.s32.totalorder (%p1019_p5), %s610_s8, 14 }
  0x16   : > { %741 = vmatprep.subr.bf16.mxu0 %v946_v1  ;;  %791 = vmatprep.mubr.msk.bf16.mxu1 %vm947_vm0, %v946_v1  ;;  %s1058_s23 = scalar_lea.vmem %s1239_s0, %s687_s15  ;;  %v883_v31 = vld [vmem:[%s1242_s3] sm:$0xff]  }
  0x17   : > { %823 = vmatpush3.bf16.msra.mxu1 %v876_v3  ;;  %v251_v5 = vld [vmem:[%s1058_s23] sm:$0xff]  ;;  %v252_v6 = vld [vmem:[%s1058_s23 + $0x8] sm:$0xff]  ;;  %v253_v9 = vld [vmem:[%s1058_s23 + $0x10] sm:$0xff] }
  0x18   : > { %816 = vmatprep.subr.bf16.mxu1 %v946_v1  ;;  %v265_v7 = vpack.c.bf16 %v252_v6, %v251_v5  ;;  %v254_v10 = vld [vmem:[%s1058_s23 + $0x18] sm:$0xff]  ;;  %v255_v14 = vld [vmem:[%s1058_s23 + $0x20] sm:$0xff]  ;;  %v256_v15 = vld [vmem:[%s1058_s23 + $0x28] sm:$0xff] }
  0x19   : > { %742 = vmatpush3.bf16.msra.mxu0 %v875_v2  ;;  %v266_v12 = vpack.c.bf16 %v254_v10, %v253_v9  ;;  %v267_v16 = vpack.c.bf16 %v256_v15, %v255_v14  ;;  %v257_v17 = vld [vmem:[%s1058_s23 + $0x30] sm:$0xff]  ;;  %v258_v18 = vld [vmem:[%s1058_s23 + $0x38] sm:$0xff]  ;;  %v259_v20 = vld [vmem:[%s1058_s23 + $0x40] sm:$0xff] }
  0x1a   : > { %771 = vmatprep.subr.bf16.mxu0 %v946_v1  ;;  %v268_v19 = vpack.c.bf16 %v258_v18, %v257_v17  ;;  %v260_v21 = vld [vmem:[%s1058_s23 + $0x48] sm:$0xff]  ;;  %v261_v23 = vld [vmem:[%s1058_s23 + $0x50] sm:$0xff]  ;;  %v262_v24 = vld [vmem:[%s1058_s23 + $0x58] sm:$0xff] }
  0x1b   : > { %824 = vmatpush3.bf16.msra.mxu1 %v877_v4  ;;  %v269_v22 = vpack.c.bf16 %v260_v21, %v259_v20  ;;  %v270_v25 = vpack.c.bf16 %v262_v24, %v261_v23  ;;  %v263_v26 = vld [vmem:[%s1058_s23 + $0x60] sm:$0xff]  ;;  %v264_v27 = vld [vmem:[%s1058_s23 + $0x68] sm:$0xff]  ;;  %s228_s23 = sand.u32 1, %s936_s19  }
  0x1c   : > { %817 = vmatprep.subr.bf16.mxu1 %v946_v1  ;;  %744 = vmatmul.mubr.msk.bf16.vlgmr.msra.gmra.mxu0 %vm295_vm1, %v265_v7  ;;  %v271_v28 = vpack.c.bf16 %v264_v27, %v263_v26  ;;  %v1129_v32 = vld [vmem:[%s1241_s2] ss:$0 sm:$0xff]  ;;  %s831_s25 = smul.u32 112, %s228_s23  ;;  %s1179_s7 = scalar_lea.sflag [#allocation3], %s228_s23 }
  0x1d   : > { %747 = vmatprep.mubr.msk.bf16.mxu0 %vm947_vm0, %v946_v1  ;;  %772 = vmatpush3.bf16.msra.mxu0 %v876_v3 }
  0x1e   : > { %773 = vmatprep.subr.bf16.mxu0 %v946_v1  ;;  %s1161_s6 = scalar_lea.vmem [#allocation2], %s831_s25 }
  0x1f   : > { %825 = vmatpush3.bf16.msra.mxu1 %v878_v8 }
  0x20   : > { %818 = vmatprep.subr.bf16.mxu1 %v946_v1 }
  0x21   : > { %774 = vmatpush3.bf16.msra.mxu0 %v877_v4 }
  0x22   : > { %775 = vmatprep.subr.bf16.mxu0 %v946_v1 }
  0x23   : > { %826 = vmatpush3.bf16.msra.mxu1 %v879_v11 }
  0x24   : > { %819 = vmatprep.subr.bf16.mxu1 %v946_v1  ;;  %748 = vmatmul.mubr.msk.bf16.gmra.mxu0 %vm295_vm1, %v266_v12 }
  0x25   : > { %751 = vmatprep.mubr.msk.bf16.mxu0 %vm947_vm0, %v946_v1  ;;  %776 = vmatpush3.bf16.msra.mxu0 %v878_v8 }
  0x26   : > { %777 = vmatprep.subr.bf16.mxu0 %v946_v1 }
  0x27   : > { %827 = vmatpush3.bf16.msra.mxu1 %v880_v13 }
  0x28   : > { %820 = vmatprep.subr.bf16.mxu1 %v946_v1 }
  0x29   : > { %778 = vmatpush3.bf16.msra.mxu0 %v879_v11 }
  0x2a   : > { %779 = vmatprep.subr.bf16.mxu0 %v946_v1 }
  0x2b   : > { %828 = vmatpush3.bf16.msra.mxu1 %v881_v29 }
  0x2c   : > { %752 = vmatmul.mubr.msk.bf16.gmra.mxu0 %vm295_vm1, %v267_v16  ;;  %821 = vmatprep.subr.bf16.mxu1 %v946_v1 }
  0x2d   : > { %755 = vmatprep.mubr.msk.bf16.mxu0 %vm947_vm0, %v946_v1  ;;  %780 = vmatpush3.bf16.msra.mxu0 %v880_v13 }
  0x2e   : > { %781 = vmatprep.subr.bf16.mxu0 %v946_v1 }
  0x2f   : > { %829 = vmatpush3.bf16.msra.mxu1 %v882_v30 }
  0x30   : > { %822 = vmatprep.subr.bf16.mxu1 %v946_v1 }
  0x31   : > { %782 = vmatpush3.bf16.msra.mxu0 %v881_v29 }
  0x32   : > { %783 = vmatprep.subr.bf16.mxu0 %v946_v1 }
  0x33   : > { %830 = vmatpush3.bf16.msra.mxu1 %v883_v31 }
  0x34   : > { %756 = vmatmul.mubr.msk.bf16.gmra.mxu0 %vm295_vm1, %v268_v19 }
  0x35   : > { %759 = vmatprep.mubr.msk.bf16.mxu0 %vm947_vm0, %v946_v1  ;;  %784 = vmatpush3.bf16.msra.mxu0 %v882_v30 }
  0x36   : > { %785 = vmatprep.subr.bf16.mxu0 %v946_v1 }
  0x39   : > { %786 = vmatpush3.bf16.msra.mxu0 %v883_v31 }
  0x3c   : > { %760 = vmatmul.mubr.msk.bf16.gmra.mxu0 %vm295_vm1, %v269_v22 }
  0x3d   : > { %763 = vmatprep.mubr.msk.bf16.mxu0 %vm947_vm0, %v946_v1 }
  0x44   : > { %764 = vmatmul.mubr.msk.bf16.gmra.mxu0 %vm295_vm1, %v270_v25 }
  0x45   : > { %767 = vmatprep.mubr.msk.bf16.mxu0 %vm947_vm0, %v946_v1 }
  0x4c   : > { %768 = vmatmul.mubr.msk.bf16.gmra.mxu0 %vm295_vm1, %v271_v28 }
  0x4d   : > { %787 = vmatprep.mubr.msk.bf16.mxu0 %vm947_vm0, %v946_v1 }
  0xdc   : > { %v351_v33 = vpop.f32.mrf.mxu0 }
  0xdd   : > { %v352_v35 = vadd.f32 %v1129_v32, %v351_v33 }
  0xde   : > { %v745_v34 = vpop.f32.mrf.mxu0 }
  0xdf   : > { %v406_v39 = vmax.f32 %v352_v35, 0.0  ;;  %v698_v34 = vld [vmem:[%s1243_s4] ss:$0 sm:$0xff] }
  0xe0   : > { %v354_v36 = vpop.f32.mrf.mxu0 }
  0xe1   : > { %v355_v37 = vadd.f32 %v1129_v32, %v354_v36 }
  0xe2   : > { %v746_v38 = vpop.f32.mrf.mxu0 }
  0xe3   : > { %v407_v40 = vmax.f32 %v355_v37, 0.0 }
  0xe4   : > { %v359_v41 = vpop.f32.mrf.mxu0 }
  0xe5   : > { %v420_v42 = vpack.c.bf16 %v407_v40, %v406_v39  ;;  %v360_v44 = vadd.f32 %v1129_v32, %v359_v41 }
  0xe6   : > { %v749_v43 = vpop.f32.mrf.mxu0 }
  0xe7   : > { %788 = vmatmul.mubr.bf16.vlgmr.msra.gmra.mxu0 %v420_v42  ;;  %v408_v48 = vmax.f32 %v360_v44, 0.0 }
  0xe8   : > { %v362_v45 = vpop.f32.mrf.mxu0 }
  0xe9   : > { %v363_v46 = vadd.f32 %v1129_v32, %v362_v45 }
  0xea   : > { %v750_v47 = vpop.f32.mrf.mxu0 }
  0xeb   : > { %v409_v49 = vmax.f32 %v363_v46, 0.0 }
  0xec   : > { %v367_v50 = vpop.f32.mrf.mxu0 }
  0xed   : > { %v421_v51 = vpack.c.bf16 %v409_v49, %v408_v48  ;;  %v368_v53 = vadd.f32 %v1129_v32, %v367_v50 }
  0xee   : > { %v753_v52 = vpop.f32.mrf.mxu0 }
  0xef   : > { %792 = vmatmul.mubr.bf16.vlgmr.msra.gmra.mxu1 %v421_v51  ;;  %v410_v57 = vmax.f32 %v368_v53, 0.0 }
  0xf0   : > { %v370_v54 = vpop.f32.mrf.mxu0  ;;  %795 = vmatprep.mubr.msk.bf16.mxu1 %vm947_vm0, %v946_v1 }
  0xf1   : > { %v371_v55 = vadd.f32 %v1129_v32, %v370_v54 }
  0xf2   : > { %v754_v56 = vpop.f32.mrf.mxu0 }
  0xf3   : > { %v411_v58 = vmax.f32 %v371_v55, 0.0 }
  0xf4   : > { %v375_v59 = vpop.f32.mrf.mxu0 }
  0xf5   : > { %v422_v60 = vpack.c.bf16 %v411_v58, %v410_v57  ;;  %v376_v62 = vadd.f32 %v1129_v32, %v375_v59 }
  0xf6   : > { %v757_v61 = vpop.f32.mrf.mxu0 }
  0xf7   : > { %796 = vmatmul.mubr.bf16.gmra.mxu1 %v422_v60  ;;  %v412_v3 = vmax.f32 %v376_v62, 0.0 }
  0xf8   : > { %v378_v63 = vpop.f32.mrf.mxu0  ;;  %799 = vmatprep.mubr.msk.bf16.mxu1 %vm947_vm0, %v946_v1 }
  0xf9   : > { %v379_v0 = vadd.f32 %v1129_v32, %v378_v63 }
  0xfa   : > { %v758_v2 = vpop.f32.mrf.mxu0 }
  0xfb   : > { %v413_v4 = vmax.f32 %v379_v0, 0.0 }
  0xfc   : > { %v383_v5 = vpop.f32.mrf.mxu0 }
  0xfd   : > { %v423_v6 = vpack.c.bf16 %v413_v4, %v412_v3  ;;  %v384_v8 = vadd.f32 %v1129_v32, %v383_v5 }
  0xfe   : > { %v761_v7 = vpop.f32.mrf.mxu0 }
  0xff   : > { %800 = vmatmul.mubr.bf16.gmra.mxu1 %v423_v6  ;;  %v414_v12 = vmax.f32 %v384_v8, 0.0 }
 0x100   : > { %v386_v9 = vpop.f32.mrf.mxu0  ;;  %803 = vmatprep.mubr.msk.bf16.mxu1 %vm947_vm0, %v946_v1 }
 0x101   : > { %v387_v10 = vadd.f32 %v1129_v32, %v386_v9 }
 0x102   : > { %v762_v11 = vpop.f32.mrf.mxu0 }
 0x103   : > { %v415_v13 = vmax.f32 %v387_v10, 0.0 }
 0x104   : > { %v391_v14 = vpop.f32.mrf.mxu0 }
 0x105   : > { %v424_v15 = vpack.c.bf16 %v415_v13, %v414_v12  ;;  %v392_v17 = vadd.f32 %v1129_v32, %v391_v14 }
 0x106   : > { %v765_v16 = vpop.f32.mrf.mxu0 }
 0x107   : > { %804 = vmatmul.mubr.bf16.gmra.mxu1 %v424_v15  ;;  %v416_v21 = vmax.f32 %v392_v17, 0.0 }
 0x108   : > { %v394_v18 = vpop.f32.mrf.mxu0  ;;  %807 = vmatprep.mubr.msk.bf16.mxu1 %vm947_vm0, %v946_v1 }
 0x109   : > { %v395_v19 = vadd.f32 %v1129_v32, %v394_v18 }
 0x10a   : > { %v766_v20 = vpop.f32.mrf.mxu0 }
 0x10b   : > { %v417_v22 = vmax.f32 %v395_v19, 0.0 }
 0x10c   : > { %v399_v23 = vpop.f32.mrf.mxu0 }
 0x10d   : > { %v425_v24 = vpack.c.bf16 %v417_v22, %v416_v21  ;;  %v400_v26 = vadd.f32 %v1129_v32, %v399_v23 }
 0x10e   : > { %v769_v25 = vpop.f32.mrf.mxu0 }
 0x10f   : > { %808 = vmatmul.mubr.bf16.gmra.mxu1 %v425_v24  ;;  %v418_v30 = vmax.f32 %v400_v26, 0.0 }
 0x110   : > { %v402_v27 = vpop.f32.mrf.mxu0  ;;  %811 = vmatprep.mubr.msk.bf16.mxu1 %vm947_vm0, %v946_v1 }
 0x111   : > { %v403_v28 = vadd.f32 %v1129_v32, %v402_v27 }
 0x112   : > { %v770_v29 = vpop.f32.mrf.mxu0 }
 0x113   : > { %v419_v31 = vmax.f32 %v403_v28, 0.0 }
 0x115   : > { %v426_v33 = vpack.c.bf16 %v419_v31, %v418_v30 }
 0x117   : > { %812 = vmatmul.mubr.bf16.gmra.mxu1 %v426_v33 }
 0x1a7   : > { %v532_v35 = vpop.f32.mrf.mxu0 }
 0x1a8   : > { %v533_v36 = vadd.f32 %v698_v34, %v532_v35 }
 0x1a9   : > { %v789_v37 = vpop.f32.mrf.mxu0 }
 0x1aa   : > { %587 = vst [vmem:[%s1161_s6] sm:$0xff] %v533_v36 }
 0x1ab   : > { %v535_v1 = vpop.f32.mrf.mxu0 }
 0x1ac   : > { %v536_v32 = vadd.f32 %v698_v34, %v535_v1 }
 0x1ad   : > { %v790_v38 = vpop.f32.mrf.mxu0 }
 0x1ae   : > { %588 = vst [vmem:[%s1161_s6 + $0x8] sm:$0xff] %v536_v32 }
 0x1af   : > { %v540_v39 = vpop.f32.mrf.mxu1 }
 0x1b0   : > { %v541_v40 = vadd.f32 %v698_v34, %v540_v39 }
 0x1b1   : > { %v793_v41 = vpop.f32.mrf.mxu1 }
 0x1b2   : > { %589 = vst [vmem:[%s1161_s6 + $0x10] sm:$0xff] %v541_v40 }
 0x1b3   : > { %v543_v42 = vpop.f32.mrf.mxu1 }
 0x1b4   : > { %v544_v43 = vadd.f32 %v698_v34, %v543_v42 }
 0x1b5   : > { %v794_v44 = vpop.f32.mrf.mxu1 }
 0x1b6   : > { %590 = vst [vmem:[%s1161_s6 + $0x18] sm:$0xff] %v544_v43 }
 0x1b7   : > { %v548_v45 = vpop.f32.mrf.mxu1 }
 0x1b8   : > { %v549_v46 = vadd.f32 %v698_v34, %v548_v45 }
 0x1b9   : > { %v797_v47 = vpop.f32.mrf.mxu1 }
 0x1ba   : > { %591 = vst [vmem:[%s1161_s6 + $0x20] sm:$0xff] %v549_v46 }
 0x1bb   : > { %v551_v48 = vpop.f32.mrf.mxu1 }
 0x1bc   : > { %v552_v49 = vadd.f32 %v698_v34, %v551_v48 }
 0x1bd   : > { %v798_v50 = vpop.f32.mrf.mxu1 }
 0x1be   : > { %592 = vst [vmem:[%s1161_s6 + $0x28] sm:$0xff] %v552_v49 }
 0x1bf   : > { %v556_v51 = vpop.f32.mrf.mxu1 }
 0x1c0   : > { %v557_v52 = vadd.f32 %v698_v34, %v556_v51 }
 0x1c1   : > { %v801_v53 = vpop.f32.mrf.mxu1 }
 0x1c2   : > { %593 = vst [vmem:[%s1161_s6 + $0x30] sm:$0xff] %v557_v52 }
 0x1c3   : > { %v559_v54 = vpop.f32.mrf.mxu1 }
 0x1c4   : > { %v560_v55 = vadd.f32 %v698_v34, %v559_v54 }
 0x1c5   : > { %v802_v56 = vpop.f32.mrf.mxu1 }
 0x1c6   : > { %594 = vst [vmem:[%s1161_s6 + $0x38] sm:$0xff] %v560_v55 }
 0x1c7   : > { %v564_v57 = vpop.f32.mrf.mxu1 }
 0x1c8   : > { %v565_v58 = vadd.f32 %v698_v34, %v564_v57 }
 0x1c9   : > { %v805_v59 = vpop.f32.mrf.mxu1 }
 0x1ca   : > { %595 = vst [vmem:[%s1161_s6 + $0x40] sm:$0xff] %v565_v58 }
 0x1cb   : > { %v567_v60 = vpop.f32.mrf.mxu1 }
 0x1cc   : > { %v568_v61 = vadd.f32 %v698_v34, %v567_v60 }
 0x1cd   : > { %v806_v62 = vpop.f32.mrf.mxu1 }
 0x1ce   : > { %596 = vst [vmem:[%s1161_s6 + $0x48] sm:$0xff] %v568_v61 }
 0x1cf   : > { %v572_v63 = vpop.f32.mrf.mxu1 }
 0x1d0   : > { %v573_v0 = vadd.f32 %v698_v34, %v572_v63 }
 0x1d1   : > { %v809_v2 = vpop.f32.mrf.mxu1 }
 0x1d2   : > { %597 = vst [vmem:[%s1161_s6 + $0x50] sm:$0xff] %v573_v0 }
 0x1d3   : > { %v575_v3 = vpop.f32.mrf.mxu1 }
 0x1d4   : > { %v576_v4 = vadd.f32 %v698_v34, %v575_v3 }
 0x1d5   : > { %v810_v5 = vpop.f32.mrf.mxu1 }
 0x1d6   : > { %598 = vst [vmem:[%s1161_s6 + $0x58] sm:$0xff] %v576_v4 }
 0x1d7   : > { %v580_v6 = vpop.f32.mrf.mxu1 }
 0x1d8   : > { %v581_v7 = vadd.f32 %v698_v34, %v580_v6 }
 0x1d9   : > { %v813_v8 = vpop.f32.mrf.mxu1 }
 0x1da   : > { %599 = vst [vmem:[%s1161_s6 + $0x60] sm:$0xff] %v581_v7  ;;  %608 = sbr.rel (!%p1019_p5) target bundleno = 506 (0x1fa), region = 44 }
 0x1db   : > { %v583_v9 = vpop.f32.mrf.mxu1 }
 0x1dc   : > { %v584_v10 = vadd.f32 %v698_v34, %v583_v9 }
 0x1dd   : > { %v814_v11 = vpop.f32.mrf.mxu1 }
 0x1de   : > { %600 = vst [vmem:[%s1161_s6 + $0x68] sm:$0xff] %v584_v10 }
 0x1df   : > { %s1252_s8 = smov (!%p611_p11, %s610_s8), 14 }
 0x1e0   : > { %s1184_s10 = sshll.u32 %s1252_s8, 7 }
 0x1e1   : > { %s615_s11 = ssub.s32 1792, %s1184_s10 }
 0x1e2   : > { %616 = vsyncadd %s1179_s7, %s615_s11  ;;  %p708_p12 = scmp.ne.s32.totalorder %s1184_s10, 0  ;;  %s714_s12 = smul.u32 1792, %s1002_s22 }
 0x1e3   : > { %s621_s13 = sshll.u32 %s1161_s6, 4  ;;  %s948_s16 = smov [#allocation2]   ;;  %s1196_s13 = int_to_ptr.vmem [resolvable:$true] %s621_s13 }
 0x1e4   : > { %s1194_s15 = scalar_lea.hbm %s1244_s5, %s714_s12  ;;  %s884_s9 = scalar_lea.vmem %s1196_s13, %s1184_s10 }
 0x1e5   : > { %p885_p13 = scmp.ne.s32.totalorder %s1196_s13, %s884_s9  ;;  %s888_s17 = sshll.u32 %s948_s16, 4  ;;  %s889_s17 = int_to_ptr.vmem [resolvable:$false] %s888_s17 }
 0x1e6   : > { %s890_s22 = scalar_lea.vmem %s889_s17, 3584  ;;  %p891_p2 = scmp.lt.s32.totalorder %s1196_s13, %s889_s17 }
 0x1e7   : > { %p886_p0 = pnand %p885_p13, %p708_p12  ;;  %p892_p3 = scmp.lt.s32.totalorder %s890_s22, %s884_s9 }
 0x1e9   : > { %p887_p1 = pneg %p886_p0  ;;  %p893_p4 = por %p892_p3, %p891_p2 }
 0x1eb   : > { %p894_p5 = pnand %p893_p4, %p887_p1 }
 0x1ed   : > { %897 = shalt.err (!%p894_p5)
}
 0x1ee   : > { %s898_s23 = scalar_lea.hbm %s1194_s15, %s1184_s10  ;;  %s902_s30 = scalar_lea.hbm %s1244_s5, 3200 }
 0x1ef   : > { %p899_p7 = scmp.ne.s32.totalorder %s1194_s15, %s898_s23  ;;  %p903_p10 = scmp.lt.s32.totalorder %s1194_s15, %s1244_s5 }
 0x1f0   : > { %p904_p11 = scmp.lt.s32.totalorder %s902_s30, %s898_s23 }
 0x1f1   : > { %p900_p8 = pnand %p899_p7, %p708_p12 }
 0x1f2   : > { %p905_p13 = por %p904_p11, %p903_p10 }
 0x1f3   : > { %p901_p9 = pneg %p900_p8 }
 0x1f5   : > { %p906_p0 = pnand %p905_p13, %p901_p9 }
 0x1f7   : > { %909 = shalt.err (!%p906_p0)
}
 0x1f8   : > { %s949_s11 = smov 128   ;;  %s950_s12 = smov 8  }
 0x1f9   : > { %627 = dma.vmem_to_hbm [thread:$0]  (%p708_p12), %s1196_s13, %s1184_s10, %s1194_s15, %s1179_s7, %s949_s11, %s949_s11, %s950_s12  }
 0x1fa PF: > { %p837_p1 = scmp.ge.s32.totalorder %s944_s21, 2  ;;  %s636_s28 = sand.u32 1, %s932_s18  }
 0x1fb   : > { %s637_s14 = scalar_lea.sflag [#allocation3], %s636_s28 }
 0x1fc   : > { %p834_p2 = pnand %p837_p1, %p1023_p6 }
 0x1fe   : > { %p835_p3 = pneg %p834_p2 }
 0x200   : > { %927 = dma.done.wait (%p835_p3), %s637_s14, 1792  }
 0x201   : > { %929 = vsyncadd (%p835_p3), %s637_s14, 4294965504  ;;  %p15_p4 = scmp.ge.s32.totalorder %s1006_s24, 4   ;;  %s1247_s18 = smov %s936_s19 }
 0x202   : > { %s1248_s19 = smov %s940_s20  ;;  %s1249_s20 = smov %s1017_s27 }
 0x203   : > { %s1250_s21 = smov %s1006_s24  ;;  %17 = sbr.rel (!%p15_p4) target bundleno = 3 (0x3), region = 75 }
 0x208   :  { %642 = vsyncpa [#allocation3], 1 }
 0x209   :  { %644 = vsyncpa [#allocation3 + $0x1], 1 }

</bundles_post_ra>
